<compile_context>
chip_gen: v7x
topology: tpu7x:2x2x1
jax: 0.10.0
libtpu: 0.0.40
codegen_flags: <defaults>
</compile_context>

<pallas_src>
import jax
import jax.numpy as jnp
from jax.experimental import pallas as pl
from jax.experimental.pallas import tpu as pltpu


def _mlp_kernel(x_ref, w1_ref, w2_ref, w3_ref, w4_ref, wo_ref, b_ref, o_ref):
    # x: (TB, F) f32. Weights are (in, out) bf16 (BN folded, 64-wide layers
    # zero-padded to 128 lanes). b_ref is an (8, 128) f32 pack:
    # row0=b1, row1=b2', row2=b3' (lanes 64: are 0), row3=b4' (lanes 64: 0),
    # row4[0]=bo'. o_ref is a lane-dense (1, TB) row.
    x = x_ref[...]

    h = jnp.dot(x.astype(jnp.bfloat16), w1_ref[...],
                preferred_element_type=jnp.float32)
    h = jnp.maximum(h + b_ref[0:1, :], 0.0)

    h = jnp.dot(h.astype(jnp.bfloat16), w2_ref[...],
                preferred_element_type=jnp.float32)
    h = jnp.maximum(h + b_ref[1:2, :], 0.0)

    h = jnp.dot(h.astype(jnp.bfloat16), w3_ref[...],
                preferred_element_type=jnp.float32)
    h = jnp.maximum(h + b_ref[2:3, :], 0.0)          # padded lanes stay 0

    h = jnp.dot(h.astype(jnp.bfloat16), w4_ref[...],
                preferred_element_type=jnp.float32)
    h = jnp.maximum(h + b_ref[3:4, :], 0.0)          # padded lanes stay 0

    # layer_out: 64(->128 padded) -> 1 as VPU multiply + lane reduction,
    # written as a lane-dense (1, TB) row.
    s = jnp.sum(h * wo_ref[...], axis=1)              # (TB,)
    o_ref[...] = (s[None, :] + b_ref[4:5, 0:1]).astype(o_ref.dtype)


def prepare_params(params, eps=1e-5):
    """One-time parameter prep: fold BN into adjacent Linear layers (in f32),
    transpose weights to (in, out), zero-pad 64-wide layers to 128 lanes,
    cast matmul weights to bf16, pack biases into one (8,128) buffer."""

    def bn_scale_shift(bn):
        scale = bn["gamma"] / jnp.sqrt(bn["var"] + eps)
        shift = bn["beta"] - bn["mean"] * scale
        return scale, shift

    s1, t1 = bn_scale_shift(params["bn1"])
    s2, t2 = bn_scale_shift(params["bn2"])
    s3, t3 = bn_scale_shift(params["bn3"])
    s4, t4 = bn_scale_shift(params["bn4"])

    # layer_1: no preceding BN.
    w1t = params["l1"]["w"].T                       # (F, 128)
    b1 = params["l1"]["b"]

    # bn1 folds into layer_2, bn2 into layer_3, bn3 into layer_4, bn4 into out.
    w2t_raw = params["l2"]["w"].T                   # (128, 128)
    w2t = s1[:, None] * w2t_raw
    b2 = t1 @ w2t_raw + params["l2"]["b"]

    w3t_raw = params["l3"]["w"].T                   # (128, 64)
    w3t = s2[:, None] * w3t_raw
    b3 = t2 @ w3t_raw + params["l3"]["b"]           # (64,)

    w4t_raw = params["l4"]["w"].T                   # (64, 64)
    w4t = s3[:, None] * w4t_raw
    b4 = t3 @ w4t_raw + params["l4"]["b"]           # (64,)

    wo_vec = params["lo"]["w"][0]                   # (64,)
    wo_row = s4 * wo_vec                            # (64,) f32 (VPU path)
    bo = jnp.sum(t4 * wo_vec) + params["lo"]["b"][0]

    # Zero-pad the 64-wide layers to 128 lanes. Padded bias lanes are exactly
    # 0, so ReLU keeps padded channels at 0 and zero weight rows/cols add
    # nothing -> bit-identical results, fully lane-dense vregs.
    w3p = jnp.zeros((128, 128), jnp.float32).at[:, :64].set(w3t)
    w4p = jnp.zeros((128, 128), jnp.float32).at[:64, :64].set(w4t)
    wop = jnp.zeros((1, 128), jnp.float32).at[0, :64].set(wo_row)

    bias_pack = jnp.zeros((8, 128), jnp.float32)
    bias_pack = bias_pack.at[0, :].set(b1)
    bias_pack = bias_pack.at[1, :].set(b2)
    bias_pack = bias_pack.at[2, :64].set(b3)
    bias_pack = bias_pack.at[3, :64].set(b4)
    bias_pack = bias_pack.at[4, 0].set(bo)

    return {
        "w1": w1t.astype(jnp.bfloat16),
        "w2": w2t.astype(jnp.bfloat16),
        "w3": w3p.astype(jnp.bfloat16),
        "w4": w4p.astype(jnp.bfloat16),
        "wo": wop,                                   # f32, VPU path
        "bias": bias_pack,
    }


def _choose_batch_tile(padded):
    """Pick the batch tile. Small batches: one full-extent tile. Larger
    batches: at least 2 lane-aligned tiles (both v7x TCs get work), capped at
    2048 rows (per-step overhead amortized; VMEM stays tiny)."""
    if padded < 512:
        return padded
    half = (padded + 1) // 2
    tb = ((half + 127) // 128) * 128                # 128-lane aligned tiles
    return min(tb, 2048)


def binary_classification_forward(x, prep):
    """x: (B, input_shape) float32. prep: output of prepare_params()."""
    B, F = x.shape
    padded = ((B + 7) // 8) * 8
    TB = _choose_batch_tile(padded)
    n_tiles = pl.cdiv(padded, TB)
    padded_b = n_tiles * TB
    if padded_b != B:
        x = jnp.pad(x, ((0, padded_b - B), (0, 0)))

    out = pl.pallas_call(
        _mlp_kernel,
        out_shape=jax.ShapeDtypeStruct((n_tiles, TB), jnp.float32),
        grid=(n_tiles,),
        in_specs=[
            pl.BlockSpec((TB, F), lambda i: (i, 0)),              # x: streamed
            pl.BlockSpec(prep["w1"].shape, lambda i: (0, 0)),     # weights:
            pl.BlockSpec(prep["w2"].shape, lambda i: (0, 0)),     #  VMEM-resident
            pl.BlockSpec(prep["w3"].shape, lambda i: (0, 0)),
            pl.BlockSpec(prep["w4"].shape, lambda i: (0, 0)),
            pl.BlockSpec(prep["wo"].shape, lambda i: (0, 0)),
            pl.BlockSpec(prep["bias"].shape, lambda i: (0, 0)),   # packed biases
        ],
        out_specs=pl.BlockSpec((1, TB), lambda i: (i, 0)),        # lane-dense row
        compiler_params=pltpu.CompilerParams(
            dimension_semantics=("parallel",),
            vmem_limit_bytes=32 << 20,
        ),
    )(x, prep["w1"], prep["w2"], prep["w3"], prep["w4"],
      prep["wo"], prep["bias"])
    return out.reshape(-1)[:B][:, None]


def init_params(key, input_shape):
    """Deterministic synthetic parameters matching the PyTorch module shapes."""
    dims = [(128, input_shape), (128, 128), (64, 128), (64, 64), (1, 64)]
    names = ["l1", "l2", "l3", "l4", "lo"]
    params = {}
    keys = jax.random.split(key, 2 * len(dims) + 4 * 4)
    ki = 0
    for name, (out_d, in_d) in zip(names, dims):
        bound = 1.0 / jnp.sqrt(in_d)
        w = jax.random.uniform(keys[ki], (out_d, in_d), jnp.float32, -bound, bound)
        ki += 1
        b = jax.random.uniform(keys[ki], (out_d,), jnp.float32, -bound, bound)
        ki += 1
        params[name] = {"w": w, "b": b}
    for name, d in zip(["bn1", "bn2", "bn3", "bn4"], [128, 128, 64, 64]):
        gamma = 1.0 + 0.1 * jax.random.normal(keys[ki], (d,), jnp.float32); ki += 1
        beta = 0.1 * jax.random.normal(keys[ki], (d,), jnp.float32); ki += 1
        mean = 0.05 * jax.random.normal(keys[ki], (d,), jnp.float32); ki += 1
        var = jnp.abs(1.0 + 0.1 * jax.random.normal(keys[ki], (d,), jnp.float32)); ki += 1
        params[name] = {"gamma": gamma, "beta": beta, "mean": mean, "var": var}
    return params


def _reference_forward(x, params):
    """Pure-JAX f32 reference (eval-mode PyTorch semantics)."""
    eps = 1e-5
    h = x
    for lname, bname in [("l1", "bn1"), ("l2", "bn2"), ("l3", "bn3"), ("l4", "bn4")]:
        h = h @ params[lname]["w"].T + params[lname]["b"]
        h = jnp.maximum(h, 0.0)
        bn = params[bname]
        h = (h - bn["mean"]) / jnp.sqrt(bn["var"] + eps) * bn["gamma"] + bn["beta"]
    return h @ params["lo"]["w"].T + params["lo"]["b"]


if __name__ == "__main__":
    key = jax.random.PRNGKey(0)
    k_x, k_x2, k_p = jax.random.split(key, 3)

    input_shape = 32
    params = init_params(k_p, input_shape)
    prep = prepare_params(params)            # one-time, outside per-call path

    # Small single-tile case.
    batch = 8
    x = jax.random.normal(k_x, (batch, input_shape), jnp.float32)
    out = jax.block_until_ready(binary_classification_forward(x, prep))
    ref = _reference_forward(x, params)
    assert out.shape == (batch, 1)
    # bf16 matmul operands -> loosen tolerance vs. the pure-f32 reference.
    assert jnp.allclose(out, ref, atol=2e-2, rtol=2e-2), (out, ref)

    # Multi-tile case (exercises padding, lane-dense row output, n_tiles>=2).
    batch2 = 600
    x2 = jax.random.normal(k_x2, (batch2, input_shape), jnp.float32)
    out2 = jax.block_until_ready(binary_classification_forward(x2, prep))
    ref2 = _reference_forward(x2, params)
    assert out2.shape == (batch2, 1)
    assert jnp.allclose(out2, ref2, atol=2e-2, rtol=2e-2)

    print("KERNEL_OK")
</pallas_src>

<mosaic_0001>
module attributes {stable_mosaic.version = 11 : i64} {
  func.func @_mlp_kernel(%arg0: i32, %arg1: memref<8x32xf32, #tpu.memory_space<vmem>>, %arg2: memref<32x128xbf16, #tpu.memory_space<vmem>>, %arg3: memref<128x128xbf16, #tpu.memory_space<vmem>>, %arg4: memref<128x128xbf16, #tpu.memory_space<vmem>>, %arg5: memref<128x128xbf16, #tpu.memory_space<vmem>>, %arg6: memref<1x128xf32, #tpu.memory_space<vmem>>, %arg7: memref<8x128xf32, #tpu.memory_space<vmem>>, %arg8: memref<1x8xf32, #tpu.memory_space<vmem>>) attributes {dimension_semantics = [#tpu.dimension_semantics<parallel>], iteration_bounds = array<i64: 1>, scalar_prefetch = 0 : i64, scratch_operands = 0 : i64, tpu.core_type = #tpu.core_type<tc>, window_params = [{transform_indices = @transform_0, window_bounds = array<i64: 8, 32>}, {pipeline_mode = #tpu.pipeline_mode<synchronous>, transform_indices = @transform_1, window_bounds = array<i64: 32, 128>}, {pipeline_mode = #tpu.pipeline_mode<synchronous>, transform_indices = @transform_2, window_bounds = array<i64: 128, 128>}, {pipeline_mode = #tpu.pipeline_mode<synchronous>, transform_indices = @transform_3, window_bounds = array<i64: 128, 128>}, {pipeline_mode = #tpu.pipeline_mode<synchronous>, transform_indices = @transform_4, window_bounds = array<i64: 128, 128>}, {pipeline_mode = #tpu.pipeline_mode<synchronous>, transform_indices = @transform_5, window_bounds = array<i64: 1, 128>}, {pipeline_mode = #tpu.pipeline_mode<synchronous>, transform_indices = @transform_6, window_bounds = array<i64: 8, 128>}, {transform_indices = @transform_7, window_bounds = array<i64: 1, 8>}]} {
    %c0 = arith.constant 0 : index
    %c0_0 = arith.constant 0 : index
    %0 = vector.load %arg1[%c0, %c0_0] : memref<8x32xf32, #tpu.memory_space<vmem>>, vector<8x32xf32>
    %1 = arith.truncf %0 : vector<8x32xf32> to vector<8x32xbf16>
    %c0_1 = arith.constant 0 : index
    %c0_2 = arith.constant 0 : index
    %2 = vector.load %arg2[%c0_1, %c0_2] : memref<32x128xbf16, #tpu.memory_space<vmem>>, vector<32x128xbf16>
    %cst = arith.constant dense<0.000000e+00> : vector<8x128xf32>
    %3 = tpu.matmul %1, %2, %cst {dimension_numbers = #tpu.dot_dimension_numbers<[1], [0], [0], [1], [0, 0, 1, 1], [], []>} : vector<8x32xbf16>, vector<32x128xbf16>, vector<8x128xf32> -> vector<8x128xf32>
    %c0_3 = arith.constant 0 : index
    %c0_4 = arith.constant 0 : index
    %4 = vector.load %arg7[%c0_3, %c0_4] : memref<8x128xf32, #tpu.memory_space<vmem>>, vector<1x128xf32>
    %5 = vector.broadcast %4 : vector<1x128xf32> to vector<8x128xf32>
    %6 = arith.addf %3, %5 : vector<8x128xf32>
    %cst_5 = arith.constant 0.000000e+00 : f32
    %7 = vector.broadcast %cst_5 : f32 to vector<8x128xf32>
    %8 = arith.maximumf %6, %7 : vector<8x128xf32>
    %9 = arith.truncf %8 : vector<8x128xf32> to vector<8x128xbf16>
    %c0_6 = arith.constant 0 : index
    %c0_7 = arith.constant 0 : index
    %10 = vector.load %arg3[%c0_6, %c0_7] : memref<128x128xbf16, #tpu.memory_space<vmem>>, vector<128x128xbf16>
    %cst_8 = arith.constant dense<0.000000e+00> : vector<8x128xf32>
    %11 = tpu.matmul %9, %10, %cst_8 {dimension_numbers = #tpu.dot_dimension_numbers<[1], [0], [0], [1], [0, 0, 1, 1], [], []>} : vector<8x128xbf16>, vector<128x128xbf16>, vector<8x128xf32> -> vector<8x128xf32>
    %c1 = arith.constant 1 : index
    %c0_9 = arith.constant 0 : index
    %12 = vector.load %arg7[%c1, %c0_9] : memref<8x128xf32, #tpu.memory_space<vmem>>, vector<1x128xf32>
    %13 = vector.broadcast %12 : vector<1x128xf32> to vector<8x128xf32>
    %14 = arith.addf %11, %13 : vector<8x128xf32>
    %cst_10 = arith.constant 0.000000e+00 : f32
    %15 = vector.broadcast %cst_10 : f32 to vector<8x128xf32>
    %16 = arith.maximumf %14, %15 : vector<8x128xf32>
    %17 = arith.truncf %16 : vector<8x128xf32> to vector<8x128xbf16>
    %c0_11 = arith.constant 0 : index
    %c0_12 = arith.constant 0 : index
    %18 = vector.load %arg4[%c0_11, %c0_12] : memref<128x128xbf16, #tpu.memory_space<vmem>>, vector<128x128xbf16>
    %cst_13 = arith.constant dense<0.000000e+00> : vector<8x128xf32>
    %19 = tpu.matmul %17, %18, %cst_13 {dimension_numbers = #tpu.dot_dimension_numbers<[1], [0], [0], [1], [0, 0, 1, 1], [], []>} : vector<8x128xbf16>, vector<128x128xbf16>, vector<8x128xf32> -> vector<8x128xf32>
    %c2 = arith.constant 2 : index
    %c0_14 = arith.constant 0 : index
    %20 = vector.load %arg7[%c2, %c0_14] : memref<8x128xf32, #tpu.memory_space<vmem>>, vector<1x128xf32>
    %21 = vector.broadcast %20 : vector<1x128xf32> to vector<8x128xf32>
    %22 = arith.addf %19, %21 : vector<8x128xf32>
    %cst_15 = arith.constant 0.000000e+00 : f32
    %23 = vector.broadcast %cst_15 : f32 to vector<8x128xf32>
    %24 = arith.maximumf %22, %23 : vector<8x128xf32>
    %25 = arith.truncf %24 : vector<8x128xf32> to vector<8x128xbf16>
    %c0_16 = arith.constant 0 : index
    %c0_17 = arith.constant 0 : index
    %26 = vector.load %arg5[%c0_16, %c0_17] : memref<128x128xbf16, #tpu.memory_space<vmem>>, vector<128x128xbf16>
    %cst_18 = arith.constant dense<0.000000e+00> : vector<8x128xf32>
    %27 = tpu.matmul %25, %26, %cst_18 {dimension_numbers = #tpu.dot_dimension_numbers<[1], [0], [0], [1], [0, 0, 1, 1], [], []>} : vector<8x128xbf16>, vector<128x128xbf16>, vector<8x128xf32> -> vector<8x128xf32>
    %c3 = arith.constant 3 : index
    %c0_19 = arith.constant 0 : index
    %28 = vector.load %arg7[%c3, %c0_19] : memref<8x128xf32, #tpu.memory_space<vmem>>, vector<1x128xf32>
    %29 = vector.broadcast %28 : vector<1x128xf32> to vector<8x128xf32>
    %30 = arith.addf %27, %29 : vector<8x128xf32>
    %cst_20 = arith.constant 0.000000e+00 : f32
    %31 = vector.broadcast %cst_20 : f32 to vector<8x128xf32>
    %32 = arith.maximumf %30, %31 : vector<8x128xf32>
    %c0_21 = arith.constant 0 : index
    %c0_22 = arith.constant 0 : index
    %33 = vector.load %arg6[%c0_21, %c0_22] : memref<1x128xf32, #tpu.memory_space<vmem>>, vector<1x128xf32>
    %34 = vector.broadcast %33 : vector<1x128xf32> to vector<8x128xf32>
    %35 = arith.mulf %32, %34 : vector<8x128xf32>
    %cst_23 = arith.constant dense<0.000000e+00> : vector<8xf32>
    %36 = vector.multi_reduction <add>, %35, %cst_23 [1] : vector<8x128xf32> to vector<8xf32>
    %37 = vector.shape_cast %36 : vector<8xf32> to vector<1x8xf32>
    %c4 = arith.constant 4 : index
    %c0_24 = arith.constant 0 : index
    %38 = vector.load %arg7[%c4, %c0_24] : memref<8x128xf32, #tpu.memory_space<vmem>>, vector<1x1xf32>
    %39 = vector.broadcast %38 : vector<1x1xf32> to vector<1x8xf32>
    %40 = arith.addf %37, %39 : vector<1x8xf32>
    %c0_25 = arith.constant 0 : index
    %c0_26 = arith.constant 0 : index
    %41 = vector.load %arg8[%c0_25, %c0_26] : memref<1x8xf32, #tpu.memory_space<vmem>>, vector<1x8xf32>
    tpu.vector_store %arg8[%c0_25, %c0_26], %40 {strides = array<i32>} : memref<1x8xf32, #tpu.memory_space<vmem>>, vector<1x8xf32>,
    return
  }
  func.func @transform_0(%arg0: i32) -> (i32, i32) {
    %c0_i32 = arith.constant 0 : i32
    %c0_i32_0 = arith.constant 0 : i32
    return %arg0, %c0_i32 : i32, i32
  }
  func.func @transform_1(%arg0: i32) -> (i32, i32) {
    %c0_i32 = arith.constant 0 : i32
    %c0_i32_0 = arith.constant 0 : i32
    %c0_i32_1 = arith.constant 0 : i32
    return %c0_i32, %c0_i32_0 : i32, i32
  }
  func.func @transform_2(%arg0: i32) -> (i32, i32) {
    %c0_i32 = arith.constant 0 : i32
    %c0_i32_0 = arith.constant 0 : i32
    %c0_i32_1 = arith.constant 0 : i32
    return %c0_i32, %c0_i32_0 : i32, i32
  }
  func.func @transform_3(%arg0: i32) -> (i32, i32) {
    %c0_i32 = arith.constant 0 : i32
    %c0_i32_0 = arith.constant 0 : i32
    %c0_i32_1 = arith.constant 0 : i32
    return %c0_i32, %c0_i32_0 : i32, i32
  }
  func.func @transform_4(%arg0: i32) -> (i32, i32) {
    %c0_i32 = arith.constant 0 : i32
    %c0_i32_0 = arith.constant 0 : i32
    %c0_i32_1 = arith.constant 0 : i32
    return %c0_i32, %c0_i32_0 : i32, i32
  }
  func.func @transform_5(%arg0: i32) -> (i32, i32) {
    %c0_i32 = arith.constant 0 : i32
    %c0_i32_0 = arith.constant 0 : i32
    %c0_i32_1 = arith.constant 0 : i32
    return %c0_i32, %c0_i32_0 : i32, i32
  }
  func.func @transform_6(%arg0: i32) -> (i32, i32) {
    %c0_i32 = arith.constant 0 : i32
    %c0_i32_0 = arith.constant 0 : i32
    %c0_i32_1 = arith.constant 0 : i32
    return %c0_i32, %c0_i32_0 : i32, i32
  }
  func.func @transform_7(%arg0: i32) -> (i32, i32) {
    %c0_i32 = arith.constant 0 : i32
    %c0_i32_0 = arith.constant 0 : i32
    return %arg0, %c0_i32 : i32, i32
  }
}

</mosaic_0001>

<bundles_post_ra>
// kernel: tpu_custom_call.1
= control target key start
LH: loop header
LB: loop body
LE: loop exit
PB: predicated region body
PF: predicated region fallthrough
CT: control target
= control target key end

     0   :  { %12 = vsyncpa [#allocation3], 0  ;;  %s1042_s0 = inlined_call_operand.hbm [shape: f32[8,32], index: 0, kind: input, shape index: {}]   ;;  %s1043_s1 = inlined_call_operand.hbm [shape: bf16[32,128], index: 1, kind: input, shape index: {}]   ;;  %s1044_s2 = inlined_call_operand.hbm [shape: bf16[128,128], index: 2, kind: input, shape index: {}]   ;;  %s1045_s3 = inlined_call_operand.hbm [shape: bf16[128,128], index: 3, kind: input, shape index: {}]   ;;  %s1046_s4 = inlined_call_operand.hbm [shape: bf16[128,128], index: 4, kind: input, shape index: {}]   ;;  %s1047_s5 = inlined_call_operand.vmem [shape: f32[1,128], index: 5, kind: input, shape index: {}]   ;;  %s1048_s6 = inlined_call_operand.vmem [shape: f32[8,128], index: 6, kind: input, shape index: {}]   ;;  %s1049_s7 = inlined_call_operand.hbm [shape: f32[1,8], index: 7, kind: output, shape index: {}]  }
   0x1   :  { %13 = vsyncpa [#allocation6], 0 }
   0x2   :  { %14 = vsyncpa [#allocation9], 0 }
   0x3   :  { %15 = vsyncpa [#allocation4], 0  ;;  %s855_s24 = smov [#allocation5]   ;;  %s715_s28 = scalar_lea.hbm %s1043_s1, 256 }
   0x4   :  { %s31_s25 = sshll.u32 %s855_s24, 4  ;;  %p716_p0 = scmp.ne.s32.totalorder %s1043_s1, %s715_s28  ;;  %s32_s25 = int_to_ptr.vmem [resolvable:$true] %s31_s25 }
   0x5   :  { %p719_p1 = scmp.lt.u32.totalorder %s715_s28, %s1043_s1 }
   0x7   :  { %p721_p2 = pnand %p719_p1, %p716_p0 }
   0x9   :  { %724 = shalt.err (!%p721_p2)
}
   0xa   :  { %s725_s10 = scalar_lea.vmem %s32_s25, 256  ;;  %p730_p4 = scmp.lt.s32.totalorder %s32_s25, %s32_s25 }
   0xb   :  { %p726_p3 = scmp.ne.s32.totalorder %s32_s25, %s725_s10  ;;  %p731_p5 = scmp.lt.s32.totalorder %s725_s10, %s725_s10 }
   0xd   :  { %p732_p6 = por %p731_p5, %p730_p4 }
   0xf   :  { %p733_p7 = pnand %p732_p6, %p726_p3 }
  0x11   :  { %736 = shalt.err (!%p733_p7)
}
  0x12   :  { %s856_s11 = smov 64   ;;  %s857_s12 = smov 4  }
  0x13   :  { %37 = dma.hbm_to_vmem [thread:$0]  %s1043_s1, 256, %s32_s25, [#allocation6], %s856_s11, %s856_s11, %s857_s12  }
  0x14   :  { %s858_s15 = smov [#allocation8]   ;;  %s859_s17 = smov [#allocation2]  }
  0x15   :  { %s55_s16 = sshll.u32 %s858_s15, 4  ;;  %s22_s18 = sshll.u32 %s859_s17, 4  ;;  %s56_s16 = int_to_ptr.vmem [resolvable:$true] %s55_s16  ;;  %s23_s18 = int_to_ptr.vmem [resolvable:$true] %s22_s18 }
  0x16   :  { %s737_s21 = scalar_lea.hbm %s1045_s3, 1024 }
  0x17   :  { %p738_p8 = scmp.ne.s32.totalorder %s1045_s3, %s737_s21  ;;  %p741_p9 = scmp.lt.u32.totalorder %s737_s21, %s1045_s3 }
  0x19   :  { %p743_p10 = pnand %p741_p9, %p738_p8 }
  0x1b   :  { %746 = shalt.err (!%p743_p10)
}
  0x1c   :  { %s747_s1 = scalar_lea.vmem %s56_s16, 1024  ;;  %p752_p12 = scmp.lt.s32.totalorder %s56_s16, %s56_s16 }
  0x1d   :  { %p748_p11 = scmp.ne.s32.totalorder %s56_s16, %s747_s1  ;;  %p753_p13 = scmp.lt.s32.totalorder %s747_s1, %s747_s1 }
  0x1f   :  { %p754_p0 = por %p753_p13, %p752_p12 }
  0x21   :  { %p755_p1 = pnand %p754_p0, %p748_p11 }
  0x23   :  { %758 = shalt.err (!%p755_p1)
}
  0x24   :  { %61 = dma.hbm_to_vmem [thread:$0]  %s1045_s3, 1024, %s56_s16, [#allocation9], %s856_s11, %s856_s11, %s857_s12  }
  0x25   :  { %s759_s30 = scalar_lea.hbm %s1042_s0, 128 }
  0x26   :  { %p760_p2 = scmp.ne.s32.totalorder %s1042_s0, %s759_s30  ;;  %p763_p3 = scmp.lt.u32.totalorder %s759_s30, %s1042_s0 }
  0x28   :  { %p765_p4 = pnand %p763_p3, %p760_p2 }
  0x2a   :  { %768 = shalt.err (!%p765_p4)
}
  0x2b   :  { %s769_s14 = scalar_lea.vmem %s23_s18, 128  ;;  %p774_p6 = scmp.lt.s32.totalorder %s23_s18, %s23_s18 }
  0x2c   :  { %p770_p5 = scmp.ne.s32.totalorder %s23_s18, %s769_s14  ;;  %p775_p7 = scmp.lt.s32.totalorder %s769_s14, %s769_s14 }
  0x2e   :  { %p776_p8 = por %p775_p7, %p774_p6 }
  0x30   :  { %p777_p9 = pnand %p776_p8, %p770_p5 }
  0x32   :  { %780 = shalt.err (!%p777_p9)
}
  0x33   :  { %25 = dma.hbm_to_vmem [thread:$0]  %s1042_s0, 128, %s23_s18, [#allocation3]  }
  0x34   :  { %s860_s16 = smov [#allocation7]   ;;  %s861_s19 = smov [#allocation10]  }
  0x35   :  { %s43_s17 = sshll.u32 %s860_s16, 4  ;;  %s67_s20 = sshll.u32 %s861_s19, 4  ;;  %s44_s17 = int_to_ptr.vmem [resolvable:$true] %s43_s17  ;;  %s68_s20 = int_to_ptr.vmem [resolvable:$true] %s67_s20 }
  0x36   :  { %s781_s23 = scalar_lea.hbm %s1044_s2, 1024 }
  0x37   :  { %p782_p10 = scmp.ne.s32.totalorder %s1044_s2, %s781_s23  ;;  %p785_p11 = scmp.lt.u32.totalorder %s781_s23, %s1044_s2 }
  0x39   :  { %p787_p12 = pnand %p785_p11, %p782_p10 }
  0x3b   :  { %790 = shalt.err (!%p787_p12)
}
  0x3c   :  { %s791_s0 = scalar_lea.vmem %s44_s17, 1024  ;;  %p796_p0 = scmp.lt.s32.totalorder %s44_s17, %s44_s17 }
  0x3d   :  { %p792_p13 = scmp.ne.s32.totalorder %s44_s17, %s791_s0  ;;  %p797_p1 = scmp.lt.s32.totalorder %s791_s0, %s791_s0 }
  0x3f   :  { %p798_p2 = por %p797_p1, %p796_p0 }
  0x41   :  { %p799_p3 = pnand %p798_p2, %p792_p13 }
  0x43   :  { %802 = shalt.err (!%p799_p3)
}
  0x44   :  { %49 = dma.hbm_to_vmem [thread:$0]  %s1044_s2, 1024, %s44_s17, [#allocation6], %s856_s11, %s856_s11, %s857_s12  }
  0x45   :  { %s803_s30 = scalar_lea.hbm %s1046_s4, 1024 }
  0x46   :  { %p804_p4 = scmp.ne.s32.totalorder %s1046_s4, %s803_s30  ;;  %p807_p5 = scmp.lt.u32.totalorder %s803_s30, %s1046_s4 }
  0x48   :  { %p809_p6 = pnand %p807_p5, %p804_p4 }
  0x4a   :  { %812 = shalt.err (!%p809_p6)
}
  0x4b   :  { %s813_s14 = scalar_lea.vmem %s68_s20, 1024  ;;  %p818_p8 = scmp.lt.s32.totalorder %s68_s20, %s68_s20 }
  0x4c   :  { %p814_p7 = scmp.ne.s32.totalorder %s68_s20, %s813_s14  ;;  %p819_p9 = scmp.lt.s32.totalorder %s813_s14, %s813_s14 }
  0x4e   :  { %p820_p10 = por %p819_p9, %p818_p8 }
  0x50   :  { %p821_p11 = pnand %p820_p10, %p814_p7 }
  0x52   :  { %824 = shalt.err (!%p821_p11)
}
  0x53   :  { %73 = dma.hbm_to_vmem [thread:$0]  %s1046_s4, 1024, %s68_s20, [#allocation9], %s856_s11, %s856_s11, %s857_s12  }
  0x54   :  { %847 = dma.done.wait [#allocation3], 128  }
  0x55   :  { %848 = vsyncadd [#allocation3], 4294967168 }
  0x56   :  { %849 = dma.done.wait [#allocation6], 1280  }
  0x57   :  { %850 = vsyncadd [#allocation6], 4294966016 }
  0x58   :  { %851 = dma.done.wait [#allocation9], 2048  }
  0x59   :  { %852 = vsyncadd [#allocation9], 4294965248  ;;  %v862_v0 = vmov 0.0   ;;  %vm863_vm0 = vmmov 0   ;;  %v689_v1 = vld [vmem:[#allocation5] sm:$0xff]   ;;  %v690_v2 = vld [vmem:[#allocation5 + $0x8] sm:$0xff]  }
  0x5a   :  { %608 = vmatprep.subr.bf16.mxu0 %v862_v0  ;;  %612 = vmatprep.mubr.msk.bf16.mxu0 %vm863_vm0, %v862_v0  ;;  %v94_v3 = vld [vmem:[#allocation2] sm:$0xff]  ;;  %v691_v4 = vld [vmem:[#allocation7] sm:$0xff]   ;;  %vm117_vm1 = vcmask 261120   ;;  %v693_v7 = vld [vmem:[#allocation7 + $0x10] sm:$0xff]   ;;  %v864_v53 = vmov 0   ;;  %vm527_vm2 = vcmask 57344  }
  0x5b   :  { %616 = vmatprep.subr.bf16.mxu1 %v862_v0  ;;  %632 = vmatprep.mubr.msk.bf16.mxu1 %vm863_vm0, %v862_v0  ;;  %v95_v5 = vpack.c.bf16 %v94_v3, %v94_v3  ;;  %v692_v6 = vld [vmem:[#allocation7 + $0x8] sm:$0xff]   ;;  %v694_v8 = vld [vmem:[#allocation7 + $0x18] sm:$0xff]   ;;  %v695_v9 = vld [vmem:[#allocation7 + $0x20] sm:$0xff]  }
  0x5c   :  { %609 = vmatpush3.bf16.msra.mxu0 %v689_v1  ;;  %617 = vmatpush3.bf16.msra.mxu1 %v691_v4  ;;  %v696_v10 = vld [vmem:[#allocation7 + $0x28] sm:$0xff]   ;;  %v697_v11 = vld [vmem:[#allocation7 + $0x30] sm:$0xff]   ;;  %v698_v12 = vld [vmem:[#allocation7 + $0x38] sm:$0xff]  }
  0x5d   :  { %610 = vmatprep.subr.bf16.mxu0 %v862_v0  ;;  %618 = vmatprep.subr.bf16.mxu1 %v862_v0  ;;  %v699_v13 = vld [vmem:[#allocation8] sm:$0xff]   ;;  %v700_v14 = vld [vmem:[#allocation8 + $0x8] sm:$0xff]   ;;  %v701_v15 = vld [vmem:[#allocation8 + $0x10] sm:$0xff]  }
  0x5e   :  { %v702_v16 = vld [vmem:[#allocation8 + $0x18] sm:$0xff]   ;;  %v703_v17 = vld [vmem:[#allocation8 + $0x20] sm:$0xff]   ;;  %v704_v18 = vld [vmem:[#allocation8 + $0x28] sm:$0xff]   ;;  %687 = vset.pattern.permute.xlu0 %v864_v53  ;;  %688 = vset.pattern.permute.xlu1 %v864_v53 }
  0x5f   :  { %v546_v19 = vld [vmem:[%s1048_s6] ss:$0 sm:$0xff]  ;;  %v705_v27 = vld [vmem:[#allocation8 + $0x30] sm:$0xff]   ;;  %v706_v28 = vld [vmem:[#allocation8 + $0x38] sm:$0xff]  }
  0x60   :  { %611 = vmatpush3.bf16.msra.mxu0 %v690_v2  ;;  %619 = vmatpush3.bf16.msra.mxu1 %v692_v6  ;;  %v707_v29 = vld [vmem:[#allocation10] sm:$0xff]   ;;  %v708_v30 = vld [vmem:[#allocation10 + $0x8] sm:$0xff]   ;;  %v709_v31 = vld [vmem:[#allocation10 + $0x10] sm:$0xff]  }
  0x61   :  { %636 = vmatprep.subr.bf16.mxu0 %v862_v0  ;;  %620 = vmatprep.subr.bf16.mxu1 %v862_v0  ;;  %v710_v32 = vld [vmem:[#allocation10 + $0x18] sm:$0xff]   ;;  %v711_v33 = vld [vmem:[#allocation10 + $0x20] sm:$0xff]   ;;  %v712_v34 = vld [vmem:[#allocation10 + $0x28] sm:$0xff]  }
  0x62   :  { %v550_v35 = vld [vmem:[%s1048_s6 + $0x1] ss:$0 sm:$0xff]  ;;  %v713_v43 = vld [vmem:[#allocation10 + $0x30] sm:$0xff]   ;;  %v714_v44 = vld [vmem:[#allocation10 + $0x38] sm:$0xff]  }
  0x63   :  { %613 = vmatmul.mubr.msk.bf16.vlgmr.msra.gmra.mrb[0].mxu0 %vm117_vm1, %v95_v5  ;;  %v559_v45 = vld [vmem:[%s1048_s6 + $0x2] ss:$0 sm:$0xff]  ;;  %v568_v54 = vld [vmem:[%s1048_s6 + $0x3] ss:$0 sm:$0xff]  ;;  %v577_v59 = vld [vmem:[%s1047_s5] ss:$0 sm:$0xff] }
  0x64   :  { %652 = vmatprep.mubr.msk.bf16.mxu0 %vm863_vm0, %v862_v0  ;;  %621 = vmatpush3.bf16.msra.mxu1 %v693_v7  ;;  %v505_v63 = vld [vmem:[%s1048_s6 + $0x4] sm:$0x1]  ;;  %s865_s5 = smov [#allocation11]  }
  0x65   :  { %622 = vmatprep.subr.bf16.mxu1 %v862_v0  ;;  %637 = vmatpush3.bf16.msra.mxu0 %v699_v13  ;;  %s535_s26 = sshll.u32 %s865_s5, 4  ;;  %s536_s26 = int_to_ptr.vmem [resolvable:$true] %s535_s26 }
  0x66   :  { %638 = vmatprep.subr.bf16.mxu0 %v862_v0  ;;  %s825_s1 = scalar_lea.vmem %s536_s26, 16  ;;  %s829_s6 = scalar_lea.vmem %s536_s26, 32 }
  0x67   :  { %p826_p12 = scmp.ne.s32.totalorder %s536_s26, %s825_s1  ;;  %p830_p13 = scmp.lt.s32.totalorder %s536_s26, %s536_s26 }
  0x68   :  { %623 = vmatpush3.bf16.msra.mxu1 %v694_v8  ;;  %p831_p0 = scmp.lt.s32.totalorder %s829_s6, %s825_s1 }
  0x69   :  { %624 = vmatprep.subr.bf16.mxu1 %v862_v0  ;;  %639 = vmatpush3.bf16.msra.mxu0 %v700_v14 }
  0x6a   :  { %640 = vmatprep.subr.bf16.mxu0 %v862_v0  ;;  %p832_p1 = por %p831_p0, %p830_p13 }
  0x6c   :  { %625 = vmatpush3.bf16.msra.mxu1 %v695_v9  ;;  %p833_p2 = pnand %p832_p1, %p826_p12 }
  0x6d   :  { %626 = vmatprep.subr.bf16.mxu1 %v862_v0  ;;  %641 = vmatpush3.bf16.msra.mxu0 %v701_v15 }
  0x6e   :  { %642 = vmatprep.subr.bf16.mxu0 %v862_v0 }
  0x70   :  { %627 = vmatpush3.bf16.msra.mxu1 %v696_v10 }
  0x71   :  { %628 = vmatprep.subr.bf16.mxu1 %v862_v0  ;;  %643 = vmatpush3.bf16.msra.mxu0 %v702_v16 }
  0x72   :  { %644 = vmatprep.subr.bf16.mxu0 %v862_v0 }
  0x74   :  { %629 = vmatpush3.bf16.msra.mxu1 %v697_v11 }
  0x75   :  { %630 = vmatprep.subr.bf16.mxu1 %v862_v0  ;;  %645 = vmatpush3.bf16.msra.mxu0 %v703_v17 }
  0x76   :  { %646 = vmatprep.subr.bf16.mxu0 %v862_v0 }
  0x78   :  { %631 = vmatpush3.bf16.msra.mxu1 %v698_v12 }
  0x79   :  { %656 = vmatprep.subr.bf16.mxu1 %v862_v0  ;;  %647 = vmatpush3.bf16.msra.mxu0 %v704_v18 }
  0x7a   :  { %648 = vmatprep.subr.bf16.mxu0 %v862_v0 }
  0x7d   :  { %649 = vmatpush3.bf16.msra.mxu0 %v705_v27 }
  0x7e   :  { %650 = vmatprep.subr.bf16.mxu0 %v862_v0 }
  0x81   :  { %651 = vmatpush3.bf16.msra.mxu0 %v706_v28 }
 0x136   :  { %v155_v20 = vpop.f32.mrb[0].mxu0 }
 0x137   :  { %v156_v21 = vadd.f32 %v546_v19, %v155_v20  ;;  %v614_v22 = vpop.f32.mrb[1].mxu0 }
 0x138   :  { %v158_v23 = vpop.f32.mrb[2].mxu0 }
 0x139   :  { %v161_v24 = vmax.f32 %v156_v21, 0.0  ;;  %v615_v25 = vpop.f32.mrb[3].mxu0 }
 0x13b   :  { %v162_v26 = vpack.c.bf16 %v161_v24, %v161_v24 }
 0x13d   :  { %633 = vmatmul.mubr.bf16.vlgmr.msra.gmra.mrb[0].mxu1 %v162_v26 }
 0x13e   :  { %672 = vmatprep.mubr.msk.bf16.mxu1 %vm863_vm0, %v862_v0  ;;  %657 = vmatpush3.bf16.msra.mxu1 %v707_v29 }
 0x13f   :  { %658 = vmatprep.subr.bf16.mxu1 %v862_v0 }
 0x142   :  { %659 = vmatpush3.bf16.msra.mxu1 %v708_v30 }
 0x143   :  { %660 = vmatprep.subr.bf16.mxu1 %v862_v0 }
 0x146   :  { %661 = vmatpush3.bf16.msra.mxu1 %v709_v31 }
 0x147   :  { %662 = vmatprep.subr.bf16.mxu1 %v862_v0 }
 0x14a   :  { %663 = vmatpush3.bf16.msra.mxu1 %v710_v32 }
 0x14b   :  { %664 = vmatprep.subr.bf16.mxu1 %v862_v0 }
 0x14e   :  { %665 = vmatpush3.bf16.msra.mxu1 %v711_v33 }
 0x14f   :  { %666 = vmatprep.subr.bf16.mxu1 %v862_v0 }
 0x152   :  { %667 = vmatpush3.bf16.msra.mxu1 %v712_v34 }
 0x153   :  { %668 = vmatprep.subr.bf16.mxu1 %v862_v0 }
 0x156   :  { %669 = vmatpush3.bf16.msra.mxu1 %v713_v43 }
 0x157   :  { %670 = vmatprep.subr.bf16.mxu1 %v862_v0  ;;  %v510_v0 = vlaneseq }
 0x159   :  { %v511_v1 = vshrl.u32 %v510_v0, 7  ;;  %v521_v2 = vand.u32 127, %v510_v0 }
 0x15a   :  { %671 = vmatpush3.bf16.msra.mxu1 %v714_v44 }
 0x15b   :  { %v524_v3 = vsub.s32 %v521_v2, %v511_v1  ;;  %v512_v5 = vsub.s32 0, %v511_v1 }
 0x210   :  { %v266_v36 = vpop.f32.mrb[0].mxu1 }
 0x211   :  { %v267_v37 = vadd.f32 %v550_v35, %v266_v36  ;;  %v634_v38 = vpop.f32.mrb[1].mxu1 }
 0x212   :  { %v269_v39 = vpop.f32.mrb[2].mxu1 }
 0x213   :  { %v272_v40 = vmax.f32 %v267_v37, 0.0  ;;  %v635_v41 = vpop.f32.mrb[3].mxu1 }
 0x215   :  { %v273_v42 = vpack.c.bf16 %v272_v40, %v272_v40 }
 0x217   :  { %653 = vmatmul.mubr.bf16.vlgmr.msra.gmra.mrb[4].mxu0 %v273_v42 }
 0x2ea   :  { %v377_v46 = vpop.f32.mrb[4].mxu0 }
 0x2eb   :  { %v378_v47 = vadd.f32 %v559_v45, %v377_v46  ;;  %v654_v48 = vpop.f32.mrb[5].mxu0 }
 0x2ec   :  { %v380_v49 = vpop.f32.mrb[6].mxu0 }
 0x2ed   :  { %v383_v50 = vmax.f32 %v378_v47, 0.0  ;;  %v655_v51 = vpop.f32.mrb[7].mxu0 }
 0x2ef   :  { %v384_v52 = vpack.c.bf16 %v383_v50, %v383_v50 }
 0x2f1   :  { %673 = vmatmul.mubr.bf16.vlgmr.msra.gmra.mrb[4].mxu1 %v384_v52 }
 0x3c4   :  { %v488_v55 = vpop.f32.mrb[4].mxu1 }
 0x3c5   :  { %v489_v56 = vadd.f32 %v568_v54, %v488_v55  ;;  %v674_v57 = vpop.f32.mrb[5].mxu1 }
 0x3c6   :  { %v491_v58 = vpop.f32.mrb[6].mxu1 }
 0x3c7   :  { %v494_v60 = vmax.f32 %v489_v56, 0.0  ;;  %v675_v61 = vpop.f32.mrb[7].mxu1 }
 0x3c9   :  { %v502_v62 = vmul.f32 %v577_v59, %v494_v60 }
 0x3cb   :  { %503 = vadd.xlane.f32.xlu0 %v502_v62 }
 0x3e1   :  { %508 = vperm.xlu0 %687, %v505_v63  }
 0x458   :  { %v504_v4 = vpop.xlane.xlu0 %503 }
 0x460   :  { %v509_v6 = vpop.permute.xlu0 %508 }
 0x461   :  { %v513_v7 = vrot.slane %v509_v6, %v512_v5 }
 0x463   :  { %v515_v8 = vadd.f32 %v513_v7, %v504_v4 }
 0x465   :  { %518 = vperm.xlu1 %688, %v515_v8  }
 0x4e4   :  { %v519_v9 = vpop.permute.xlu1 %518 }
 0x4e5   :  { %v525_v10 = vrot.slane %v519_v9, %v524_v3 }
 0x4e7   :  { %528 = vst.msk [vmem:[#allocation11] sm:$0x1] %vm527_vm2, %v525_v10 }
 0x4e8   :  { %836 = shalt.err (!%p833_p2)
}
 0x4e9   :  { %s837_s18 = scalar_lea.hbm %s1049_s7, 16 }
 0x4ea   :  { %p838_p3 = scmp.ne.s32.totalorder %s1049_s7, %s837_s18  ;;  %p841_p4 = scmp.lt.u32.totalorder %s837_s18, %s1049_s7 }
 0x4ec   :  { %p843_p5 = pnand %p841_p4, %p838_p3 }
 0x4ee   :  { %846 = shalt.err (!%p843_p5)
}
 0x4ef   :  { %538 = dma.vmem_to_hbm [thread:$0]  %s536_s26, 16, %s1049_s7, [#allocation4]  }
 0x4f0   :  { %853 = dma.done.wait [#allocation4], 16  }
 0x4f1   :  { %854 = vsyncadd [#allocation4], 4294967280 }
 0x4f2   :  { %542 = vsyncpa [#allocation3], 1 }
 0x4f3   :  { %543 = vsyncpa [#allocation6], 1 }
 0x4f4   :  { %544 = vsyncpa [#allocation9], 1 }
 0x4f5   :  { %545 = vsyncpa [#allocation4], 1 }

</bundles_post_ra>
